<compile_context>
chip_gen: v5e
topology: v5e:2x2
jax: 0.10.0
libtpu: 0.0.40
codegen_flags: <defaults>
</compile_context>

<pallas_src>
import jax
import jax.numpy as jnp
from jax.experimental import pallas as pl
from jax.experimental.pallas import tpu as pltpu

_LANE = 128
_SUB = 8


def _drift_kernel(x_ref, w_ref, b_ref, o_ref):
    # x_ref/o_ref: (block_rows, cols) VMEM tiles; w_ref/b_ref: (1,) SMEM scalars.
    w = w_ref[0]
    b = b_ref[0]
    o_ref[...] = jnp.maximum(x_ref[...] * w + b, 0.0).astype(o_ref.dtype)


def drift_forward(t, x, weight, bias, *, lane_tile=1024, block_rows=256):
    """Pallas equivalent of Drift.forward(t, x) = relu(Linear(1,1)(x))."""
    del t  # unused, matches the PyTorch forward signature
    assert x.shape[-1] == 1, "Drift.fc is nn.Linear(1, 1)"
    orig_shape = x.shape
    dtype = x.dtype

    # Linear(1, 1): y = weight[0, 0] * x + bias[0]  (elementwise scalar affine).
    w_s = weight.reshape(-1)[:1].astype(dtype)   # (1,)
    b_s = bias.reshape(-1)[:1].astype(dtype)     # (1,)

    total = x.size
    flat = x.reshape(-1)

    # Lane-dense slab: cols multiple of 128, rows multiple of 8.
    cols = max(lane_tile, _LANE)
    while cols > _LANE and total < _SUB * cols:
        cols //= 2
    rows = pl.cdiv(total, cols)
    if rows >= block_rows:
        br = block_rows
    else:
        br = _SUB * pl.cdiv(rows, _SUB)
    rows_p = br * pl.cdiv(rows, br)

    padded = rows_p * cols
    if padded != total:
        flat = jnp.pad(flat, (0, padded - total))
    x2 = flat.reshape(rows_p, cols)

    grid = (rows_p // br,)

    out2 = pl.pallas_call(
        _drift_kernel,
        out_shape=jax.ShapeDtypeStruct((rows_p, cols), dtype),
        grid_spec=pltpu.PrefetchScalarGridSpec(
            num_scalar_prefetch=0,
            grid=grid,
            in_specs=[
                pl.BlockSpec((br, cols), lambda i: (i, 0)),
                pl.BlockSpec(memory_space=pltpu.MemorySpace.SMEM),  # weight scalar
                pl.BlockSpec(memory_space=pltpu.MemorySpace.SMEM),  # bias scalar
            ],
            out_specs=pl.BlockSpec((br, cols), lambda i: (i, 0)),
        ),
        compiler_params=pltpu.CompilerParams(
            dimension_semantics=("parallel",),
        ),
    )(x2, w_s, b_s)

    return out2.reshape(-1)[:total].reshape(orig_shape)


if __name__ == "__main__":
    key = jax.random.PRNGKey(0)
    kx, kw, kb = jax.random.split(key, 3)

    # Shapes consistent with Drift: fc = Linear(1, 1), x is (batch, 1).
    x = jax.random.normal(kx, (2, 1), dtype=jnp.float32)
    weight = 0.5 * jax.random.normal(kw, (1, 1), dtype=jnp.float32)
    bias = 0.5 * jax.random.normal(kb, (1,), dtype=jnp.float32)
    t = jnp.float32(0.0)  # drift time argument, unused (as in the PyTorch module)

    out = drift_forward(t, x, weight, bias)
    out = jax.block_until_ready(out)

    # Reference: relu(x @ W^T + b), same semantics as torch.nn.Linear + ReLU.
    ref = jnp.maximum(x @ weight.T + bias, 0.0)
    assert out.shape == ref.shape, (out.shape, ref.shape)
    assert out.dtype == x.dtype
    assert jnp.allclose(out, ref, atol=1e-6, rtol=1e-6), (out, ref)

    print("KERNEL_OK")
</pallas_src>

<mosaic_0001>
module attributes {stable_mosaic.version = 11 : i64} {
  func.func @_drift_kernel(%arg0: i32, %arg1: memref<8x128xf32, #tpu.memory_space<vmem>>, %arg2: memref<1xf32, #tpu.memory_space<smem>>, %arg3: memref<1xf32, #tpu.memory_space<smem>>, %arg4: memref<8x128xf32, #tpu.memory_space<vmem>>) attributes {dimension_semantics = [#tpu.dimension_semantics<parallel>], iteration_bounds = array<i64: 1>, scalar_prefetch = 0 : i64, scratch_operands = 0 : i64, tpu.core_type = #tpu.core_type<tc>, window_params = [{transform_indices = @transform_0, window_bounds = array<i64: 8, 128>}, {transform_indices = @transform_1, window_bounds = array<i64: 1>}, {transform_indices = @transform_2, window_bounds = array<i64: 1>}, {transform_indices = @transform_3, window_bounds = array<i64: 8, 128>}]} {
    %c0 = arith.constant 0 : index
    %0 = memref.load %arg2[%c0] : memref<1xf32, #tpu.memory_space<smem>>
    %c0_0 = arith.constant 0 : index
    %1 = memref.load %arg3[%c0_0] : memref<1xf32, #tpu.memory_space<smem>>
    %c0_1 = arith.constant 0 : index
    %c0_2 = arith.constant 0 : index
    %2 = vector.load %arg1[%c0_1, %c0_2] : memref<8x128xf32, #tpu.memory_space<vmem>>, vector<8x128xf32>
    %3 = vector.broadcast %0 : f32 to vector<8x128xf32>
    %4 = arith.mulf %2, %3 : vector<8x128xf32>
    %5 = vector.broadcast %1 : f32 to vector<8x128xf32>
    %6 = arith.addf %4, %5 : vector<8x128xf32>
    %cst = arith.constant 0.000000e+00 : f32
    %7 = vector.broadcast %cst : f32 to vector<8x128xf32>
    %8 = arith.maximumf %6, %7 : vector<8x128xf32>
    %c0_3 = arith.constant 0 : index
    %c0_4 = arith.constant 0 : index
    %9 = vector.load %arg4[%c0_3, %c0_4] : memref<8x128xf32, #tpu.memory_space<vmem>>, vector<8x128xf32>
    tpu.vector_store %arg4[%c0_3, %c0_4], %8 {strides = array<i32>} : memref<8x128xf32, #tpu.memory_space<vmem>>, vector<8x128xf32>,
    return
  }
  func.func @transform_0(%arg0: i32) -> (i32, i32) {
    %c0_i32 = arith.constant 0 : i32
    %c0_i32_0 = arith.constant 0 : i32
    return %arg0, %c0_i32 : i32, i32
  }
  func.func @transform_1(%arg0: i32) -> i32 {
    %c0_i32 = arith.constant 0 : i32
    %c0_i32_0 = arith.constant 0 : i32
    return %c0_i32 : i32
  }
  func.func @transform_2(%arg0: i32) -> i32 {
    %c0_i32 = arith.constant 0 : i32
    %c0_i32_0 = arith.constant 0 : i32
    return %c0_i32 : i32
  }
  func.func @transform_3(%arg0: i32) -> (i32, i32) {
    %c0_i32 = arith.constant 0 : i32
    %c0_i32_0 = arith.constant 0 : i32
    return %arg0, %c0_i32 : i32, i32
  }
}

</mosaic_0001>

<bundles_post_ra>
// kernel: tpu_custom_call.1
= control target key start
LH: loop header
LB: loop body
LE: loop exit
PB: predicated region body
PF: predicated region fallthrough
CT: control target
= control target key end

     0   :  { %10 = vsyncpa [#allocation5], 0  ;;  %s145_s0 = inlined_call_operand.hbm [shape: f32[8,128], index: 0, kind: input, shape index: {}]   ;;  %s146_s1 = inlined_call_operand.<no memory space> [shape: f32[1], index: 1, kind: input, shape index: {}]   ;;  %s147_s2 = inlined_call_operand.<no memory space> [shape: f32[1], index: 2, kind: input, shape index: {}]   ;;  %s148_s3 = inlined_call_operand.hbm [shape: f32[8,128], index: 3, kind: output, shape index: {}]  }
   0x1   :  { %11 = vsyncpa [#allocation6], 0  ;;  %s17_s14 = sshll.u32 %s145_s0, 4  ;;  %s111_s15 = smov [#allocation4]   ;;  %s18_s14 = int_to_ptr.hbm [resolvable:$true] %s17_s14 }
   0x2   :  { %s19_s16 = sshll.u32 %s111_s15, 4  ;;  %s20_s16 = int_to_ptr.vmem [resolvable:$true] %s19_s16 }
   0x3   :  { %22 = dma.hbm_to_vmem [thread:$0]  %s18_s14, 128, %s20_s16, [#allocation5]  }
   0x4   :  { %107 = dma.done.wait [#allocation5], 128  }
   0x5   :  { %108 = vsyncadd [#allocation5], 4294967168  ;;  %v34_v0 = vstv %s146_s1  ;;  %v33_v1 = vld [vmem:[#allocation4] sm:$0xff]  ;;  %v36_v2 = vstv %s147_s2  ;;  %s112_s21 = smov [#allocation7]   ;;  %s47_s24 = sshll.u32 %s148_s3, 4  ;;  %s48_s24 = int_to_ptr.hbm [resolvable:$true] %s47_s24 }
   0x6   :  { %v35_v3 = vmul.f32 %v34_v0, %v33_v1  ;;  %s45_s22 = sshll.u32 %s112_s21, 4  ;;  %s46_s22 = int_to_ptr.vmem [resolvable:$true] %s45_s22 }
   0x8   :  { %v37_v4 = vadd.f32 %v36_v2, %v35_v3 }
   0xa   :  { %v38_v5 = vmax.f32 %v37_v4, 0.0 }
   0xc   :  { %39 = vst [vmem:[#allocation7] sm:$0xff] %v38_v5 }
   0xd   :  { %50 = dma.vmem_to_hbm [thread:$0]  %s46_s22, 128, %s48_s24, [#allocation6]  }
   0xe   :  { %109 = dma.done.wait [#allocation6], 128  }
   0xf   :  { %110 = vsyncadd [#allocation6], 4294967168 }
  0x10   :  { %55 = vsyncpa [#allocation5], 1 }
  0x11   :  { %56 = vsyncpa [#allocation6], 1 }

</bundles_post_ra>
